<compile_context>
chip_gen: v7x
topology: tpu7x:2x2x1
jax: 0.10.0
libtpu: 0.0.40
codegen_flags: <defaults>
</compile_context>

<pallas_src>
import jax
import jax.numpy as jnp
from jax.experimental import pallas as pl
from jax.experimental.pallas import tpu as pltpu


def _round_up(x, m):
    return ((x + m - 1) // m) * m


def _make_kernel(C, S, Bt, offs):
    """Fused StateCritic forward for one chunk of Bt batch elements.

    Data tile is (C, Mt) with Mt = Bt*S columns ordered (seq-major,
    batch-minor), so sequence pooling is a sum of S static lane slices and the
    output is a lane-dense (1, Bt) row.
    """
    Mt = Bt * S
    r_w1, r_b1, r_w2, r_b2, r_w3, r_b3 = offs

    def kernel(x_ref, slab_ref, out_ref):
        # x_ref   : (1, C, Mt)  one chunk, channels x (seq, batch) columns
        # slab_ref: (R, W)      packed fused weights / biases (8-row aligned)
        # out_ref : (1, 1, Bt)  lane-dense per-batch critic values
        x = x_ref[0]                                   # (C, Mt)

        w1t = slab_ref[r_w1:r_w1 + 20, 0:C]            # (20, C)  fused enc+fc1
        b1t = slab_ref[r_b1:r_b1 + 20, 0:1]            # (20, 1)
        w2t = slab_ref[r_w2:r_w2 + 20, 0:20]           # (20, 20)
        b2t = slab_ref[r_b2:r_b2 + 20, 0:1]            # (20, 1)
        w3c = slab_ref[r_w3:r_w3 + 20, 0:1]            # (20, 1)
        b3s = slab_ref[r_b3:r_b3 + 1, 0:1]             # (1, 1)  = S * b3

        # fc1 over the (virtual) concatenated hidden state, encoders folded in.
        o1 = jnp.maximum(
            jnp.dot(w1t, x, preferred_element_type=jnp.float32) + b1t, 0.0)
        # fc2 + relu
        o2 = jnp.maximum(
            jnp.dot(w2t, o1, preferred_element_type=jnp.float32) + b2t, 0.0)

        # fc3 as a VPU multiply + sublane reduce -> one (1, Mt) row.
        vals = jnp.sum(o2 * w3c, axis=0, keepdims=True)        # (1, Mt)

        # Sequence pooling: columns are ordered s-major / batch-minor, so the
        # sum over the sequence is S static lane slices of width Bt.
        pooled = vals[:, 0:Bt]
        for s in range(1, S):
            pooled = pooled + vals[:, s * Bt:(s + 1) * Bt]     # (1, Bt)

        out_ref[0] = pooled + b3s                              # lane-dense store

    return kernel


def _pack_slab(params, S, C):
    """Fuses encoders into fc1 and packs all (transposed) operands into one
    (R, W) slab with every operand starting on an 8-row (sublane) boundary."""
    w_se, b_se = params["w_se"], params["b_se"]   # (Cs,H), (1,H)
    w_de, b_de = params["w_de"], params["b_de"]   # (Cd,H), (1,H)
    w1s, w1d, b1 = params["w1s"], params["w1d"], params["b1"]  # (H,20)x2,(1,20)
    w2, b2 = params["w2"], params["b2"]           # (20,20), (1,20)
    w3, b3 = params["w3"], params["b3"]           # (20,1),  (1,1)

    # Exact algebraic fusion (no nonlinearity between encoder and fc1).
    w1f = jnp.concatenate([w_se @ w1s, w_de @ w1d], axis=0)   # (C, 20)
    b1f = b_se @ w1s + b_de @ w1d + b1                        # (1, 20)

    W = max(20, C)
    blocks = [
        w1f.T,                      # (20, C)
        b1f.T,                      # (20, 1)
        w2.T,                       # (20, 20)
        b2.T,                       # (20, 1)
        w3,                         # (20, 1)
        b3 * jnp.float32(S),        # (1, 1)   b3 folded with the S-sum
    ]
    offs, padded, off = [], [], 0
    for blk in blocks:
        r, c = blk.shape
        r8 = _round_up(r, 8)
        padded.append(jnp.pad(blk, ((0, r8 - r), (0, W - c))))
        offs.append(off)
        off += r8
    slab = jnp.concatenate(padded, axis=0).astype(jnp.float32)  # (R, W)
    return slab, tuple(offs)


def state_critic_forward(static, dynamic, params, *, block_rows=4096):
    """static: (B, Cs, S), dynamic: (B, Cd, S)  -- PyTorch NCL layout."""
    B, Cs, S = static.shape
    _, Cd, _ = dynamic.shape
    C = Cs + Cd

    # Chunk size: ~block_rows (batch, seq) columns per grid step, capped by B.
    Bt = max(1, min(B, max(1, block_rows // S)))
    B_pad = _round_up(B, Bt)
    num_chunks = B_pad // Bt
    Mt = Bt * S

    # One channel-concat + one transposed copy: (B,C,S) -> (chunks, C, S*Bt)
    # with columns ordered seq-major / batch-minor inside each chunk.
    # TODO(synk): accept the native (B, C, S) layout end-to-end (fuse this
    #             relayout into the producer) to drop the extra HBM pass.
    x = jnp.concatenate([static, dynamic], axis=1).astype(jnp.float32)
    if B_pad != B:
        x = jnp.pad(x, ((0, B_pad - B), (0, 0), (0, 0)))
    x = x.reshape(num_chunks, Bt, C, S)
    x = jnp.transpose(x, (0, 2, 3, 1)).reshape(num_chunks, C, Mt)

    slab, offs = _pack_slab(params, S, C)
    R, W = slab.shape

    kernel = _make_kernel(C, S, Bt, offs)

    out = pl.pallas_call(
        kernel,
        out_shape=jax.ShapeDtypeStruct((num_chunks, 1, Bt), jnp.float32),
        grid=(num_chunks,),
        in_specs=[
            pl.BlockSpec((1, C, Mt), lambda i: (i, 0, 0)),
            pl.BlockSpec((R, W), lambda i: (0, 0)),    # constant -> one DMA
        ],
        out_specs=pl.BlockSpec((1, 1, Bt), lambda i: (i, 0, 0)),
        compiler_params=pltpu.CompilerParams(
            dimension_semantics=("parallel",),
            vmem_limit_bytes=32 * 1024 * 1024,
        ),
    )(x, slab)

    # Batch rows B..B_pad are bias-driven garbage from zero padding; slice off.
    return out.reshape(B_pad)[:B].reshape(B, 1)


def _xavier_uniform(key, fan_in, fan_out, shape):
    bound = jnp.sqrt(6.0 / (fan_in + fan_out))
    return jax.random.uniform(key, shape, jnp.float32, -bound, bound)


def init_params(key, static_size, dynamic_size, hidden_size):
    ks = jax.random.split(key, 10)
    H = hidden_size
    # Conv1d(out, in, 1) weights stored transposed as (in, out); xavier-uniform
    # like the PyTorch module.
    w_se = _xavier_uniform(ks[0], static_size, H, (static_size, H))
    w_de = _xavier_uniform(ks[1], dynamic_size, H, (dynamic_size, H))
    w1 = _xavier_uniform(ks[2], 2 * H, 20, (2 * H, 20))
    w2 = _xavier_uniform(ks[3], 20, 20, (20, 20))
    w3 = _xavier_uniform(ks[4], 20, 1, (20, 1))

    # Biases: PyTorch Conv1d default uniform(-1/sqrt(fan_in), +1/sqrt(fan_in)).
    def _bias(k, fan_in, shape):
        bound = 1.0 / jnp.sqrt(jnp.float32(fan_in))
        return jax.random.uniform(k, shape, jnp.float32, -bound, bound)

    b_se = _bias(ks[5], static_size, (1, H))
    b_de = _bias(ks[6], dynamic_size, (1, H))
    b1 = _bias(ks[7], 2 * H, (1, 20))
    b2 = _bias(ks[8], 20, (1, 20))
    b3 = _bias(ks[9], 20, (1, 1))
    return {
        "w_se": w_se, "b_se": b_se,
        "w_de": w_de, "b_de": b_de,
        "w1s": w1[:H], "w1d": w1[H:], "b1": b1,
        "w2": w2, "b2": b2,
        "w3": w3, "b3": b3,
    }


def _reference_forward(static, dynamic, p):
    # Plain-JAX reference of the exact PyTorch semantics (NCL inputs).
    s = jnp.transpose(static, (0, 2, 1))   # (B, S, Cs)
    d = jnp.transpose(dynamic, (0, 2, 1))  # (B, S, Cd)
    sh = s @ p["w_se"] + p["b_se"]
    dh = d @ p["w_de"] + p["b_de"]
    o1 = jax.nn.relu(sh @ p["w1s"] + dh @ p["w1d"] + p["b1"])
    o2 = jax.nn.relu(o1 @ p["w2"] + p["b2"])
    o3 = o2 @ p["w3"] + p["b3"]            # (B, S, 1)
    return jnp.sum(o3, axis=1)             # (B, 1)


if __name__ == "__main__":
    B, STATIC_SIZE, DYNAMIC_SIZE, HIDDEN, SEQ = 2, 4, 4, 32, 8

    key = jax.random.PRNGKey(0)
    k_s, k_d, k_p = jax.random.split(key, 3)
    static = jax.random.normal(k_s, (B, STATIC_SIZE, SEQ), jnp.float32)
    dynamic = jax.random.normal(k_d, (B, DYNAMIC_SIZE, SEQ), jnp.float32)
    params = init_params(k_p, STATIC_SIZE, DYNAMIC_SIZE, HIDDEN)

    out = state_critic_forward(static, dynamic, params)
    out = jax.block_until_ready(out)

    ref = _reference_forward(static, dynamic, params)
    assert out.shape == (B, 1), out.shape
    assert jnp.allclose(out, ref, atol=1e-4, rtol=1e-4), (out, ref)

    print("KERNEL_OK")
</pallas_src>

<mosaic_0001>
module attributes {stable_mosaic.version = 11 : i64} {
  func.func @kernel(%arg0: i32, %arg1: memref<1x8x16xf32, #tpu.memory_space<vmem>>, %arg2: memref<128x20xf32, #tpu.memory_space<vmem>>, %arg3: memref<1x1x2xf32, #tpu.memory_space<vmem>>) attributes {dimension_semantics = [#tpu.dimension_semantics<parallel>], iteration_bounds = array<i64: 1>, scalar_prefetch = 0 : i64, scratch_operands = 0 : i64, tpu.core_type = #tpu.core_type<tc>, window_params = [{transform_indices = @transform_0, window_bounds = array<i64: 1, 8, 16>}, {pipeline_mode = #tpu.pipeline_mode<synchronous>, transform_indices = @transform_1, window_bounds = array<i64: 128, 20>}, {transform_indices = @transform_2, window_bounds = array<i64: 1, 1, 2>}]} {
    %c0 = arith.constant 0 : index
    %c0_0 = arith.constant 0 : index
    %c0_1 = arith.constant 0 : index
    %0 = vector.load %arg1[%c0, %c0_0, %c0_1] : memref<1x8x16xf32, #tpu.memory_space<vmem>>, vector<1x8x16xf32>
    %1 = vector.shape_cast %0 : vector<1x8x16xf32> to vector<8x16xf32>
    %c0_2 = arith.constant 0 : index
    %c0_3 = arith.constant 0 : index
    %2 = vector.load %arg2[%c0_2, %c0_3] : memref<128x20xf32, #tpu.memory_space<vmem>>, vector<20x8xf32>
    %c24 = arith.constant 24 : index
    %c0_4 = arith.constant 0 : index
    %3 = vector.load %arg2[%c24, %c0_4] : memref<128x20xf32, #tpu.memory_space<vmem>>, vector<20x1xf32>
    %c48 = arith.constant 48 : index
    %c0_5 = arith.constant 0 : index
    %4 = vector.load %arg2[%c48, %c0_5] : memref<128x20xf32, #tpu.memory_space<vmem>>, vector<20x20xf32>
    %c72 = arith.constant 72 : index
    %c0_6 = arith.constant 0 : index
    %5 = vector.load %arg2[%c72, %c0_6] : memref<128x20xf32, #tpu.memory_space<vmem>>, vector<20x1xf32>
    %c96 = arith.constant 96 : index
    %c0_7 = arith.constant 0 : index
    %6 = vector.load %arg2[%c96, %c0_7] : memref<128x20xf32, #tpu.memory_space<vmem>>, vector<20x1xf32>
    %c120 = arith.constant 120 : index
    %c0_8 = arith.constant 0 : index
    %7 = vector.load %arg2[%c120, %c0_8] : memref<128x20xf32, #tpu.memory_space<vmem>>, vector<1x1xf32>
    %cst = arith.constant dense<0.000000e+00> : vector<20x16xf32>
    %8 = tpu.matmul %2, %1, %cst {dimension_numbers = #tpu.dot_dimension_numbers<[1], [0], [0], [1], [0, 0, 1, 1], [], []>} : vector<20x8xf32>, vector<8x16xf32>, vector<20x16xf32> -> vector<20x16xf32>
    %9 = vector.broadcast %3 : vector<20x1xf32> to vector<20x16xf32>
    %10 = arith.addf %8, %9 : vector<20x16xf32>
    %cst_9 = arith.constant 0.000000e+00 : f32
    %11 = vector.broadcast %cst_9 : f32 to vector<20x16xf32>
    %12 = arith.maximumf %10, %11 : vector<20x16xf32>
    %cst_10 = arith.constant dense<0.000000e+00> : vector<20x16xf32>
    %13 = tpu.matmul %4, %12, %cst_10 {dimension_numbers = #tpu.dot_dimension_numbers<[1], [0], [0], [1], [0, 0, 1, 1], [], []>} : vector<20x20xf32>, vector<20x16xf32>, vector<20x16xf32> -> vector<20x16xf32>
    %14 = vector.broadcast %5 : vector<20x1xf32> to vector<20x16xf32>
    %15 = arith.addf %13, %14 : vector<20x16xf32>
    %cst_11 = arith.constant 0.000000e+00 : f32
    %16 = vector.broadcast %cst_11 : f32 to vector<20x16xf32>
    %17 = arith.maximumf %15, %16 : vector<20x16xf32>
    %18 = vector.broadcast %6 : vector<20x1xf32> to vector<20x16xf32>
    %19 = arith.mulf %17, %18 : vector<20x16xf32>
    %cst_12 = arith.constant dense<0.000000e+00> : vector<16xf32>
    %20 = vector.multi_reduction <add>, %19, %cst_12 [0] : vector<20x16xf32> to vector<16xf32>
    %21 = vector.shape_cast %20 : vector<16xf32> to vector<1x16xf32>
    %22 = vector.extract_strided_slice %21 {offsets = [0, 0], sizes = [1, 2], strides = [1, 1]} : vector<1x16xf32> to vector<1x2xf32>
    %23 = vector.extract_strided_slice %21 {offsets = [0, 2], sizes = [1, 2], strides = [1, 1]} : vector<1x16xf32> to vector<1x2xf32>
    %24 = arith.addf %22, %23 : vector<1x2xf32>
    %25 = vector.extract_strided_slice %21 {offsets = [0, 4], sizes = [1, 2], strides = [1, 1]} : vector<1x16xf32> to vector<1x2xf32>
    %26 = arith.addf %24, %25 : vector<1x2xf32>
    %27 = vector.extract_strided_slice %21 {offsets = [0, 6], sizes = [1, 2], strides = [1, 1]} : vector<1x16xf32> to vector<1x2xf32>
    %28 = arith.addf %26, %27 : vector<1x2xf32>
    %29 = vector.extract_strided_slice %21 {offsets = [0, 8], sizes = [1, 2], strides = [1, 1]} : vector<1x16xf32> to vector<1x2xf32>
    %30 = arith.addf %28, %29 : vector<1x2xf32>
    %31 = vector.extract_strided_slice %21 {offsets = [0, 10], sizes = [1, 2], strides = [1, 1]} : vector<1x16xf32> to vector<1x2xf32>
    %32 = arith.addf %30, %31 : vector<1x2xf32>
    %33 = vector.extract_strided_slice %21 {offsets = [0, 12], sizes = [1, 2], strides = [1, 1]} : vector<1x16xf32> to vector<1x2xf32>
    %34 = arith.addf %32, %33 : vector<1x2xf32>
    %35 = vector.extract_strided_slice %21 {offsets = [0, 14], sizes = [1, 2], strides = [1, 1]} : vector<1x16xf32> to vector<1x2xf32>
    %36 = arith.addf %34, %35 : vector<1x2xf32>
    %37 = vector.broadcast %7 : vector<1x1xf32> to vector<1x2xf32>
    %38 = arith.addf %36, %37 : vector<1x2xf32>
    %c0_13 = arith.constant 0 : index
    %c0_14 = arith.constant 0 : index
    %c0_15 = arith.constant 0 : index
    %39 = vector.load %arg3[%c0_13, %c0_14, %c0_15] : memref<1x1x2xf32, #tpu.memory_space<vmem>>, vector<1x1x2xf32>
    %40 = vector.shape_cast %39 : vector<1x1x2xf32> to vector<1x2xf32>
    %41 = vector.shape_cast %38 : vector<1x2xf32> to vector<1x1x2xf32>
    tpu.vector_store %arg3[%c0_13, %c0_14, %c0_15], %41 {strides = array<i32>} : memref<1x1x2xf32, #tpu.memory_space<vmem>>, vector<1x1x2xf32>,
    return
  }
  func.func @transform_0(%arg0: i32) -> (i32, i32, i32) {
    %c0_i32 = arith.constant 0 : i32
    %c0_i32_0 = arith.constant 0 : i32
    %c0_i32_1 = arith.constant 0 : i32
    return %arg0, %c0_i32, %c0_i32_0 : i32, i32, i32
  }
  func.func @transform_1(%arg0: i32) -> (i32, i32) {
    %c0_i32 = arith.constant 0 : i32
    %c0_i32_0 = arith.constant 0 : i32
    %c0_i32_1 = arith.constant 0 : i32
    return %c0_i32, %c0_i32_0 : i32, i32
  }
  func.func @transform_2(%arg0: i32) -> (i32, i32, i32) {
    %c0_i32 = arith.constant 0 : i32
    %c0_i32_0 = arith.constant 0 : i32
    %c0_i32_1 = arith.constant 0 : i32
    return %arg0, %c0_i32, %c0_i32_0 : i32, i32, i32
  }
}

</mosaic_0001>

<bundles_post_ra>
// kernel: tpu_custom_call.1
= control target key start
LH: loop header
LB: loop body
LE: loop exit
PB: predicated region body
PF: predicated region fallthrough
CT: control target
= control target key end

     0   :  { %vm44_vm0 = vcmask 64512   ;;  %v415_v2 = vmov 0.0   ;;  %vm416_vm1 = vmmov 0   ;;  %v417_v4 = vmov 0   ;;  %s522_s0 = inlined_call_operand.vmem [shape: f32[1,8,16], index: 0, kind: input, shape index: {}]   ;;  %s523_s1 = inlined_call_operand.vmem [shape: f32[128,20], index: 1, kind: input, shape index: {}]   ;;  %s524_s2 = inlined_call_operand.hbm [shape: f32[1,1,2], index: 2, kind: output, shape index: {}]  }
   0x1   :  { %v12_v0 = vld [vmem:[%s522_s0] sm:$0xff]  ;;  %348 = vmatprep.subr.mxu0 %v415_v2  ;;  %350 = vmatprep.mubr.msk.f32.mxu0 %vm416_vm1, %v415_v2  ;;  %v16_v3 = vld [vmem:[%s523_s1 + $0x18] sm:$0xff]  ;;  %v18_v5 = vld [vmem:[%s523_s1 + $0x28] sm:$0xf] }
   0x2   :  { %v13_v1 = vld [vmem:[%s523_s1] sm:$0xff]  ;;  %349 = vmatpush3.msra.mxu0 %v12_v0  ;;  %389 = vset.pattern.permute.xlu0 %v417_v4  ;;  %v14_v6 = vld [vmem:[%s523_s1 + $0x8] sm:$0xff] }
   0x3   :  { %351 = vmatmul.mubr.msk.f32.vlgmr.msra.gmra.mrb[0].mxu0 %vm44_vm0, %v13_v1  ;;  %31 = vperm.xlu0 %389, %v16_v3   ;;  %v17_v7 = vld [vmem:[%s523_s1 + $0x20] sm:$0xff] }
   0x4   :  { %353 = vmatprep.mubr.msk.f32.mxu0 %vm416_vm1, %v415_v2  ;;  %390 = vset.pattern.permute.xlu1 %v417_v4 }
   0x5   :  { %7 = vsyncpa [#allocation3], 0  ;;  %41 = vperm.xlu1 %390, %v18_v5   ;;  %365 = vmatprep.mubr.msk.f32.mxu1 %vm416_vm1, %v415_v2  ;;  %v22_v8 = vld [vmem:[%s523_s1 + $0x48] sm:$0xff]  ;;  %v15_v9 = vld [vmem:[%s523_s1 + $0x10] sm:$0xf]  ;;  %v418_v15 = vmov 0.0|0.0  }
   0x6   :  { %v23_v10 = vld [vmem:[%s523_s1 + $0x50] sm:$0xff]  ;;  %v24_v11 = vld [vmem:[%s523_s1 + $0x58] sm:$0xf]  ;;  %v25_v12 = vld [vmem:[%s523_s1 + $0x60] sm:$0xff]  ;;  %374 = vmatprep.subr.bf16.mxu1 %v418_v15  ;;  %vm162_vm2 = vcmask 1043456   ;;  %vm152_vm3 = vcmask 162816  }
   0x7   :  { %354 = vmatmul.mubr.msk.f32.gmra.mrb[2].mxu0 %vm44_vm0, %v14_v6  ;;  %36 = vperm.xlu0 %389, %v17_v7   ;;  %v26_v13 = vld [vmem:[%s523_s1 + $0x68] sm:$0xff]  ;;  %v27_v14 = vld [vmem:[%s523_s1 + $0x70] sm:$0xf]  ;;  %v20_v33 = vld [vmem:[%s523_s1 + $0x38] sm:$0xff]  ;;  %vm267_vm4 = vcmask 130048   ;;  %vm271_vm5 = vcmask 125952  }
   0x8   :  { %356 = vmatprep.mubr.msk.f32.mxu0 %vm416_vm1, %v415_v2  ;;  %v19_v32 = vld [vmem:[%s523_s1 + $0x30] sm:$0xff]  ;;  %v21_v34 = vld [vmem:[%s523_s1 + $0x40] sm:$0xf]  ;;  %s419_s12 = smov 124   ;;  %s420_s13 = smov 126   ;;  %vm315_vm6 = vcmask 8192  }
   0x9   :  { %139 = vperm.xlu1 %390, %v22_v8   ;;  %s421_s14 = smov 120   ;;  %s422_s0 = smov 122   ;;  %v28_v3 = vld [vmem:[%s523_s1 + $0x78] sm:$0x1] }
   0xa   :  { %s423_s17 = smov 118   ;;  %s424_s18 = smov 114  }
   0xb   :  { %357 = vmatmul.mubr.msk.f32.gmra.mrb[4].mxu0 %vm44_vm0, %v15_v9  ;;  %144 = vperm.xlu0 %389, %v23_v10   ;;  %s425_s19 = smov 116   ;;  %s426_s1 = smov [#allocation2]  }
   0xc   :  { %s323_s20 = sshll.u32 %s426_s1, 4  ;;  %s324_s20 = int_to_ptr.vmem [resolvable:$true] %s323_s20 }
   0xd   :  { %149 = vperm.xlu1 %390, %v24_v11   ;;  %s391_s21 = scalar_lea.vmem %s324_s20, 16  ;;  %s395_s22 = scalar_lea.vmem %s324_s20, 32 }
   0xe   :  { %p392_p0 = scmp.ne.s32.totalorder %s324_s20, %s391_s21  ;;  %p396_p1 = scmp.lt.s32.totalorder %s324_s20, %s324_s20 }
   0xf   :  { %251 = vperm.xlu0 %389, %v25_v12   ;;  %p397_p2 = scmp.lt.s32.totalorder %s395_s22, %s391_s21 }
  0x11   :  { %256 = vperm.xlu1 %390, %v26_v13   ;;  %p398_p3 = por %p397_p2, %p396_p1 }
  0x13   :  { %261 = vperm.xlu0 %389, %v27_v14   ;;  %p399_p4 = pnand %p398_p3, %p392_p0 }
  0x82   :  { %v32_v16 = vpop.permute.xlu0 %31 }
  0x84   :  { %v42_v26 = vpop.permute.xlu1 %41 }
  0x86   :  { %v37_v20 = vpop.permute.xlu0 %36 }
  0x88   :  { %v140_v35 = vpop.permute.xlu1 %139 }
  0x8a   :  { %v145_v36 = vpop.permute.xlu0 %144 }
  0x8c   :  { %v150_v40 = vpop.permute.xlu1 %149 }
  0x8e   :  { %v252_v45 = vpop.permute.xlu0 %251 }
  0x90   :  { %v257_v48 = vpop.permute.xlu1 %256 }
  0x92   :  { %v262_v56 = vpop.permute.xlu0 %261 }
  0xd6   :  { %v120_v17 = vpop.f32.mrb[0].mxu0 }
  0xd7   :  { %v352_v18 = vpop.f32.mrb[1].mxu0  ;;  %v121_v19 = vadd.f32 %v120_v17, %v32_v16 }
  0xd9   :  { %v134_v24 = vmax.f32 %v121_v19, 0.0 }
  0xda   :  { %v125_v21 = vpop.f32.mrb[2].mxu0 }
  0xdb   :  { %v126_v22 = vadd.f32 %v125_v21, %v37_v20  ;;  %v355_v23 = vpop.f32.mrb[3].mxu0 }
  0xdd   :  { %v135_v25 = vmax.f32 %v126_v22, 0.0 }
  0xde   :  { %v130_v27 = vpop.f32.mrb[4].mxu0 }
  0xdf   :  { %v131_v28 = vadd.f32 %v130_v27, %v42_v26  ;;  %v358_v29 = vpop.f32.mrb[5].mxu0  ;;  %v375_v30 = vpack.c.bf16 %v135_v25, %v134_v24 }
  0xe1   :  { %v136_v31 = vmax.f32 %v131_v28, 0.0  ;;  %376 = vmatpush3.bf16.msra.mxu1 %v375_v30 }
  0xe2   :  { %363 = vmatprep.subr.mxu1 %v415_v2 }
  0xe5   :  { %364 = vmatpush3.msk.msra.mxu1 %vm162_vm2, %v136_v31 }
  0xe6   :  { %366 = vmatmul.mubr.msk.f32.vlgmr.msra.gmra.mrb[0].mxu1 %vm152_vm3, %v19_v32 }
  0xe7   :  { %368 = vmatprep.mubr.msk.f32.mxu1 %vm416_vm1, %v415_v2 }
  0xea   :  { %369 = vmatmul.mubr.msk.f32.gmra.mrb[2].mxu1 %vm152_vm3, %v20_v33 }
  0xeb   :  { %371 = vmatprep.mubr.msk.f32.mxu1 %vm416_vm1, %v415_v2 }
  0xee   :  { %372 = vmatmul.mubr.msk.f32.gmra.mrb[4].mxu1 %vm152_vm3, %v21_v34 }
 0x1b9   :  { %v232_v37 = vpop.f32.mrb[0].mxu1 }
 0x1ba   :  { %v233_v38 = vadd.f32 %v232_v37, %v140_v35  ;;  %v367_v39 = vpop.f32.mrb[1].mxu1 }
 0x1bc   :  { %v246_v41 = vmax.f32 %v233_v38, 0.0 }
 0x1bd   :  { %v237_v42 = vpop.f32.mrb[2].mxu1 }
 0x1be   :  { %v238_v43 = vadd.f32 %v237_v42, %v145_v36  ;;  %v370_v44 = vpop.f32.mrb[3].mxu1  ;;  %v264_v46 = vmul.f32 %v252_v45, %v246_v41 }
 0x1c0   :  { %v247_v47 = vmax.f32 %v238_v43, 0.0  ;;  %v268_v53 = vsel %vm267_vm4, %v264_v46, 0.0 }
 0x1c1   :  { %v242_v49 = vpop.f32.mrb[4].mxu1 }
 0x1c2   :  { %v265_v50 = vmul.f32 %v257_v48, %v247_v47  ;;  %v243_v51 = vadd.f32 %v242_v49, %v150_v40  ;;  %v373_v52 = vpop.f32.mrb[5].mxu1 }
 0x1c4   :  { %v269_v54 = vsel %vm267_vm4, %v265_v50, 0.0  ;;  %v248_v55 = vmax.f32 %v243_v51, 0.0 }
 0x1c5   :  { %v270_v57 = vadd.f32 %v269_v54, %v268_v53 }
 0x1c6   :  { %v266_v58 = vmul.f32 %v262_v56, %v248_v55 }
 0x1c8   :  { %v272_v59 = vsel %vm271_vm5, %v266_v58, 0.0 }
 0x1c9   :  { %v273_v60 = vadd.f32 %v272_v59, %v270_v57 }
 0x1cb   :  { %v274_v61 = vrot.slane %v273_v60, 4 }
 0x1cd   :  { %v275_v62 = vadd.f32 %v274_v61, %v273_v60 }
 0x1cf   :  { %v276_v63 = vrot.slane %v275_v62, 2 }
 0x1d1   :  { %v277_v0 = vadd.f32 %v276_v63, %v275_v62 }
 0x1d3   :  { %v278_v1 = vrot.slane %v277_v0, 1 }
 0x1d5   :  { %v279_v2 = vadd.f32 %v278_v1, %v277_v0 }
 0x1d7   :  { %285 = vrot.lane.b32.xlu0 %v279_v2, %s419_s12  ;;  %281 = vrot.lane.b32.xlu1 %v279_v2, %s420_s13 }
 0x1db   :  { %293 = vrot.lane.b32.xlu0 %v279_v2, %s421_s14  ;;  %289 = vrot.lane.b32.xlu1 %v279_v2, %s422_s0 }
 0x1df   :  { %297 = vrot.lane.b32.xlu0 %v279_v2, %s423_s17  ;;  %311 = vperm.xlu1 %390, %v28_v3  }
 0x1e3   :  { %305 = vrot.lane.b32.xlu0 %v279_v2, %s424_s18  ;;  %301 = vrot.lane.b32.xlu1 %v279_v2, %s425_s19 }
 0x249   :  { %v282_v4 = vpop.permute.xlu1 %281  ;;  %v286_v6 = vpop.permute.xlu0 %285 }
 0x24a   :  { %v284_v5 = vadd.f32 %v282_v4, %v279_v2 }
 0x24c   :  { %v288_v7 = vadd.f32 %v286_v6, %v284_v5 }
 0x24d   :  { %v290_v8 = vpop.permute.xlu1 %289  ;;  %v294_v9 = vpop.permute.xlu0 %293 }
 0x24e   :  { %v292_v10 = vadd.f32 %v290_v8, %v288_v7 }
 0x250   :  { %v296_v11 = vadd.f32 %v294_v9, %v292_v10 }
 0x251   :  { %v298_v12 = vpop.permute.xlu0 %297 }
 0x252   :  { %v300_v14 = vadd.f32 %v298_v12, %v296_v11 }
 0x255   :  { %v306_v17 = vpop.permute.xlu0 %305 }
 0x25e   :  { %v312_v13 = vpop.permute.xlu1 %311 }
 0x262   :  { %v302_v15 = vpop.permute.xlu1 %301 }
 0x263   :  { %v304_v16 = vadd.f32 %v302_v15, %v300_v14 }
 0x265   :  { %v308_v18 = vadd.f32 %v306_v17, %v304_v16 }
 0x267   :  { %v314_v19 = vadd.f32 %v312_v13, %v308_v18 }
 0x269   :  { %316 = vst.msk [vmem:[#allocation2] sm:$0x1] %vm315_vm6, %v314_v19 }
 0x26a   :  { %402 = shalt.err (!%p399_p4)
}
 0x26b   :  { %s403_s25 = scalar_lea.hbm %s524_s2, 16 }
 0x26c   :  { %p404_p5 = scmp.ne.s32.totalorder %s524_s2, %s403_s25  ;;  %p407_p6 = scmp.lt.u32.totalorder %s403_s25, %s524_s2 }
 0x26e   :  { %p409_p7 = pnand %p407_p6, %p404_p5 }
 0x270   :  { %412 = shalt.err (!%p409_p7)
}
 0x271   :  { %326 = dma.vmem_to_hbm [thread:$0]  %s324_s20, 16, %s524_s2, [#allocation3]  }
 0x272   :  { %413 = dma.done.wait [#allocation3], 16  }
 0x273   :  { %414 = vsyncadd [#allocation3], 4294967280 }
 0x274   :  { %330 = vsyncpa [#allocation3], 1 }

</bundles_post_ra>
